<compile_context>
chip_gen: v7x
topology: tpu7x:2x2x1
jax: 0.10.0
libtpu: 0.0.40
codegen_flags: <defaults>
</compile_context>

<pallas_src>
from functools import partial

import jax
import jax.numpy as jnp
from jax.experimental import pallas as pl
from jax.experimental.pallas import tpu as pltpu


# --------------------------------------------------------------------------
# Kernel
# --------------------------------------------------------------------------
def last_spiking_kernel(x_ref, w_ref, b_ref, o_ref, *, T, inv_T):
    # x_ref: [1, T, C, hw_tile] (f32 / bf16 / int8 spikes)
    # w_ref: [Cout_p, C] f32      b_ref: [Cout_p, 1] f32
    # o_ref: [1, Cout_p, hw_tile]
    #
    # Streamed T reduction: one [C, hw_tile] load + VPU add per step; only the
    # f32 accumulator stays live (T is static, so this Python loop is the
    # fully-unrolled equivalent of lax.fori_loop(..., unroll=True) and never
    # materializes a [T, C, hw_tile] value -> no vreg spills at big tiles).
    x_sum = x_ref[0, 0].astype(jnp.float32)
    for t in range(1, T):
        x_sum = x_sum + x_ref[0, t].astype(jnp.float32)

    # Single MXU matmul per tile: [Cout_p, C] @ [C, hw_tile] -> [Cout_p, hw_tile]
    y = jnp.dot(w_ref[...], x_sum, preferred_element_type=jnp.float32)

    # 1/T scale folded after the matmul; bias added once (algebraically
    # identical to mean_t(Wx_t + b)).
    o_ref[0] = (y * inv_T + b_ref[...]).astype(o_ref.dtype)


# --------------------------------------------------------------------------
# Tiling / VMEM sizing helpers
# --------------------------------------------------------------------------
def _physical_vmem_bytes():
    """Per-core physical VMEM; conservative fallback (v7x per-TC) if unknown."""
    try:
        info = pltpu.get_tpu_info()
        for name in ("vmem_capacity_bytes", "vmem_bytes", "vmem_size_bytes"):
            v = getattr(info, name, None)
            if v:
                return int(v)
    except Exception:
        pass
    return 64 << 20


def _pick_hw_tile(HW, B, bytes_per_col, fixed_bytes, buffered_budget,
                  min_steps=8):
    """Largest lane-dense (128-multiple) HW tile within the VMEM budget,
    shrunk if needed so the grid has >= min_steps steps (v7x: 2 TCs x 4)."""
    if HW <= 128:
        return HW  # full dim; legal under the (8,128) rule
    avail = max(buffered_budget - fixed_bytes, 128 * max(bytes_per_col, 1))
    budget_tile = max(128, (avail // max(bytes_per_col, 1)) // 128 * 128)
    tile = min((HW // 128) * 128, budget_tile)
    # Load balance / pipeline depth across TensorCores.
    while tile > 128 and B * pl.cdiv(HW, tile) < min_steps:
        tile -= 128
    return tile


# --------------------------------------------------------------------------
# Wrapper
# --------------------------------------------------------------------------
def last_spiking(x, weight, bias, T, *, out_dtype=jnp.float32):
    """x: [B, T, Cin, H, W] (f32 / bf16 / int8 spikes);
    weight: [Cout, Cin, 1, 1]; bias: [Cout].  Returns [B, Cout, H, W]."""
    B, Tdim, C, H, W = x.shape
    assert Tdim == T
    Cout = weight.shape[0]
    HW = H * W

    # Channels-first slabs: pure reshapes, NO transposes in HBM.  x keeps its
    # (possibly narrow) HBM dtype; the kernel casts to f32 per chunk.
    x_cf = x.reshape(B, T, C, HW)                       # [B, T, C, HW]
    w2d = weight[:, :, 0, 0].astype(jnp.float32)        # [Cout, Cin]
    b2d = bias.reshape(Cout, 1).astype(jnp.float32)     # broadcast along lanes

    # Pad Cout to a sublane multiple (weights/bias/out writeback are tiny
    # relative to the T*C input reads; keeps the f32 output block aligned).
    Cout_p = pl.cdiv(Cout, 8) * 8
    if Cout_p != Cout:
        w2d = jnp.pad(w2d, ((0, Cout_p - Cout), (0, 0)))
        b2d = jnp.pad(b2d, ((0, Cout_p - Cout), (0, 0)))

    # Per-generation VMEM sizing (v5e/v6e 128 MiB, v7x 64 MiB/TC).
    phys_vmem = _physical_vmem_bytes()
    vmem_limit = min(int(phys_vmem * 0.75), 100 << 20)      # headroom vs physical
    buffered_budget = min(int(phys_vmem * 0.45), 64 << 20)  # x/out dbl-buf + w/b

    x_bytes = jnp.dtype(x.dtype).itemsize
    o_bytes = jnp.dtype(out_dtype).itemsize
    bytes_per_col = 2 * T * C * x_bytes + 2 * Cout_p * o_bytes   # double-buffered
    fixed_bytes = Cout_p * C * 4 + Cout_p * 128 * 4              # resident w, b

    hw_tile = _pick_hw_tile(HW, B, bytes_per_col, fixed_bytes, buffered_budget)
    n_hw = pl.cdiv(HW, hw_tile)   # cdiv grid: robust to HW % hw_tile != 0

    out = pl.pallas_call(
        partial(last_spiking_kernel, T=T, inv_T=1.0 / T),
        out_shape=jax.ShapeDtypeStruct((B, Cout_p, HW), out_dtype),
        grid_spec=pltpu.PrefetchScalarGridSpec(
            num_scalar_prefetch=0,
            grid=(B, n_hw),
            in_specs=[
                pl.BlockSpec((1, T, C, hw_tile), lambda bi, hi: (bi, 0, 0, hi)),
                pl.BlockSpec((Cout_p, C), lambda bi, hi: (0, 0)),   # resident
                pl.BlockSpec((Cout_p, 1), lambda bi, hi: (0, 0)),   # resident
            ],
            out_specs=pl.BlockSpec((1, Cout_p, hw_tile),
                                   lambda bi, hi: (bi, 0, hi)),
        ),
        compiler_params=pltpu.CompilerParams(
            dimension_semantics=("parallel", "parallel"),
            vmem_limit_bytes=vmem_limit,
        ),
    )(x_cf, w2d, b2d)

    # [B, Cout_p, HW] -> NCHW; drop Cout padding if any.
    out = out.reshape(B, Cout_p, H, W)
    if Cout_p != Cout:
        out = out[:, :Cout]
    return out


# --------------------------------------------------------------------------
# Pure-JAX reference (mirrors the PyTorch module with block = 1x1 conv+bias)
# --------------------------------------------------------------------------
def last_spiking_reference(x, weight, bias, T):
    w2d = weight[:, :, 0, 0]  # [Cout, Cin]
    y = jnp.einsum("btchw,oc->btohw", x, w2d) + bias[None, None, :, None, None]
    return y.sum(axis=1) / T


if __name__ == "__main__":
    B, T, C, H, W = 2, 4, 4, 16, 16
    Cout = 8

    key = jax.random.PRNGKey(0)
    kx, kw, kb, ks = jax.random.split(key, 4)
    x = jax.random.normal(kx, (B, T, C, H, W), dtype=jnp.float32)
    weight = jax.random.normal(kw, (Cout, C, 1, 1), dtype=jnp.float32) * 0.1
    bias = jax.random.normal(kb, (Cout,), dtype=jnp.float32) * 0.1

    # f32 path
    out = jax.block_until_ready(last_spiking(x, weight, bias, T))
    ref = last_spiking_reference(x, weight, bias, T)
    assert out.shape == (B, Cout, H, W)
    assert jnp.allclose(out, ref, atol=1e-4, rtol=1e-4)

    # bf16 spike path: 0/1 spikes stored narrow in HBM (half the dominant DMA
    # bytes); the in-kernel f32 cast keeps the T-sum / matmul exact.
    spikes = jax.random.bernoulli(ks, 0.3, (B, T, C, H, W)).astype(jnp.bfloat16)
    out_s = jax.block_until_ready(last_spiking(spikes, weight, bias, T))
    ref_s = last_spiking_reference(spikes.astype(jnp.float32), weight, bias, T)
    assert jnp.allclose(out_s, ref_s, atol=1e-4, rtol=1e-4)

    print("KERNEL_OK")
</pallas_src>

<mosaic_0001>
module attributes {stable_mosaic.version = 11 : i64} {
  func.func @last_spiking_kernel(%arg0: i32, %arg1: i32, %arg2: memref<1x4x4x128xf32, #tpu.memory_space<vmem>>, %arg3: memref<8x4xf32, #tpu.memory_space<vmem>>, %arg4: memref<8x1xf32, #tpu.memory_space<vmem>>, %arg5: memref<1x8x128xf32, #tpu.memory_space<vmem>>) attributes {dimension_semantics = [#tpu.dimension_semantics<parallel>, #tpu.dimension_semantics<parallel>], iteration_bounds = array<i64: 2, 2>, scalar_prefetch = 0 : i64, scratch_operands = 0 : i64, tpu.core_type = #tpu.core_type<tc>, window_params = [{transform_indices = @transform_0, window_bounds = array<i64: 1, 4, 4, 128>}, {pipeline_mode = #tpu.pipeline_mode<synchronous>, transform_indices = @transform_1, window_bounds = array<i64: 8, 4>}, {pipeline_mode = #tpu.pipeline_mode<synchronous>, transform_indices = @transform_2, window_bounds = array<i64: 8, 1>}, {transform_indices = @transform_3, window_bounds = array<i64: 1, 8, 128>}]} {
    %c0 = arith.constant 0 : index
    %c0_0 = arith.constant 0 : index
    %c0_1 = arith.constant 0 : index
    %c0_2 = arith.constant 0 : index
    %0 = vector.load %arg2[%c0, %c0_0, %c0_1, %c0_2] : memref<1x4x4x128xf32, #tpu.memory_space<vmem>>, vector<1x1x4x128xf32>
    %1 = vector.shape_cast %0 : vector<1x1x4x128xf32> to vector<4x128xf32>
    %c0_3 = arith.constant 0 : index
    %c1 = arith.constant 1 : index
    %c0_4 = arith.constant 0 : index
    %c0_5 = arith.constant 0 : index
    %2 = vector.load %arg2[%c0_3, %c1, %c0_4, %c0_5] : memref<1x4x4x128xf32, #tpu.memory_space<vmem>>, vector<1x1x4x128xf32>
    %3 = vector.shape_cast %2 : vector<1x1x4x128xf32> to vector<4x128xf32>
    %4 = arith.addf %1, %3 : vector<4x128xf32>
    %c0_6 = arith.constant 0 : index
    %c2 = arith.constant 2 : index
    %c0_7 = arith.constant 0 : index
    %c0_8 = arith.constant 0 : index
    %5 = vector.load %arg2[%c0_6, %c2, %c0_7, %c0_8] : memref<1x4x4x128xf32, #tpu.memory_space<vmem>>, vector<1x1x4x128xf32>
    %6 = vector.shape_cast %5 : vector<1x1x4x128xf32> to vector<4x128xf32>
    %7 = arith.addf %4, %6 : vector<4x128xf32>
    %c0_9 = arith.constant 0 : index
    %c3 = arith.constant 3 : index
    %c0_10 = arith.constant 0 : index
    %c0_11 = arith.constant 0 : index
    %8 = vector.load %arg2[%c0_9, %c3, %c0_10, %c0_11] : memref<1x4x4x128xf32, #tpu.memory_space<vmem>>, vector<1x1x4x128xf32>
    %9 = vector.shape_cast %8 : vector<1x1x4x128xf32> to vector<4x128xf32>
    %10 = arith.addf %7, %9 : vector<4x128xf32>
    %c0_12 = arith.constant 0 : index
    %c0_13 = arith.constant 0 : index
    %11 = vector.load %arg3[%c0_12, %c0_13] : memref<8x4xf32, #tpu.memory_space<vmem>>, vector<8x4xf32>
    %cst = arith.constant dense<0.000000e+00> : vector<8x128xf32>
    %12 = tpu.matmul %11, %10, %cst {dimension_numbers = #tpu.dot_dimension_numbers<[1], [0], [0], [1], [0, 0, 1, 1], [], []>} : vector<8x4xf32>, vector<4x128xf32>, vector<8x128xf32> -> vector<8x128xf32>
    %cst_14 = arith.constant 2.500000e-01 : f32
    %13 = vector.broadcast %cst_14 : f32 to vector<8x128xf32>
    %14 = arith.mulf %12, %13 : vector<8x128xf32>
    %c0_15 = arith.constant 0 : index
    %c0_16 = arith.constant 0 : index
    %15 = vector.load %arg4[%c0_15, %c0_16] : memref<8x1xf32, #tpu.memory_space<vmem>>, vector<8x1xf32>
    %16 = vector.broadcast %15 : vector<8x1xf32> to vector<8x128xf32>
    %17 = arith.addf %14, %16 : vector<8x128xf32>
    %c0_17 = arith.constant 0 : index
    %c0_18 = arith.constant 0 : index
    %c0_19 = arith.constant 0 : index
    %18 = vector.load %arg5[%c0_17, %c0_18, %c0_19] : memref<1x8x128xf32, #tpu.memory_space<vmem>>, vector<1x8x128xf32>
    %19 = vector.shape_cast %18 : vector<1x8x128xf32> to vector<8x128xf32>
    %20 = vector.shape_cast %17 : vector<8x128xf32> to vector<1x8x128xf32>
    tpu.vector_store %arg5[%c0_17, %c0_18, %c0_19], %20 {strides = array<i32>} : memref<1x8x128xf32, #tpu.memory_space<vmem>>, vector<1x8x128xf32>,
    return
  }
  func.func @transform_0(%arg0: i32, %arg1: i32) -> (i32, i32, i32, i32) {
    %c0_i32 = arith.constant 0 : i32
    %c0_i32_0 = arith.constant 0 : i32
    %c0_i32_1 = arith.constant 0 : i32
    return %arg0, %c0_i32, %c0_i32_0, %arg1 : i32, i32, i32, i32
  }
  func.func @transform_1(%arg0: i32, %arg1: i32) -> (i32, i32) {
    %c0_i32 = arith.constant 0 : i32
    %c0_i32_0 = arith.constant 0 : i32
    %c0_i32_1 = arith.constant 0 : i32
    return %c0_i32, %c0_i32_0 : i32, i32
  }
  func.func @transform_2(%arg0: i32, %arg1: i32) -> (i32, i32) {
    %c0_i32 = arith.constant 0 : i32
    %c0_i32_0 = arith.constant 0 : i32
    %c0_i32_1 = arith.constant 0 : i32
    return %c0_i32, %c0_i32_0 : i32, i32
  }
  func.func @transform_3(%arg0: i32, %arg1: i32) -> (i32, i32, i32) {
    %c0_i32 = arith.constant 0 : i32
    %c0_i32_0 = arith.constant 0 : i32
    return %arg0, %c0_i32, %arg1 : i32, i32, i32
  }
}

</mosaic_0001>

<bundles_post_ra>
// kernel: tpu_custom_call.1
= control target key start
LH: loop header
LB: loop body
LE: loop exit
PB: predicated region body
PF: predicated region fallthrough
CT: control target
= control target key end

     0   :  { %8 = vsyncpa [#allocation3], 0  ;;  %s875_s0 = inlined_call_operand.hbm [shape: f32[2,4,4,256], index: 0, kind: input, shape index: {}]   ;;  %s876_s1 = inlined_call_operand.vmem [shape: f32[8,4], index: 1, kind: input, shape index: {}]   ;;  %s877_s2 = inlined_call_operand.vmem [shape: f32[8,1], index: 2, kind: input, shape index: {}]   ;;  %s878_s3 = inlined_call_operand.hbm [shape: f32[2,8,256], index: 3, kind: output, shape index: {}]  }
   0x1   :  { %10 = vsyncpa [#allocation3 + $0x1], 0 }
   0x2   :  { %11 = vsyncpa [#allocation4], 0 }
   0x3   :  { %13 = vsyncpa [#allocation4 + $0x1], 0  ;;  %s675_s12 = smov 0   ;;  %s677_s13 = smov 0  }
   0x4   :  { %s679_s14 = smov 0   ;;  %s681_s15 = smov 0  }
   0x5   :  { %s683_s16 = smov 0   ;;  %s685_s17 = smov 0  }
   0x6   :  { %s687_s18 = smov 0   ;;  %s689_s19 = smov 0  }
   0x7 LB: > { %s405_s20 = sadd.s32 4294967295, %s645_s19   ;;  %s406_s21 = sadd.s32 4294967294, %s645_s19   ;;  %s645_s19 = sphi %s689_s19, %s19_s19   ;;  %s641_s18 = sphi %s687_s18, %s896_s18   ;;  %s637_s17 = sphi %s685_s17, %s895_s17   ;;  %s633_s16 = sphi %s683_s16, %s894_s16   ;;  %s629_s15 = sphi %s681_s15, %s893_s15   ;;  %s625_s14 = sphi %s679_s14, %s892_s14   ;;  %s621_s13 = sphi %s677_s13, %s891_s13   ;;  %s617_s12 = sphi %s675_s12, %s890_s12  }
   0x8   : > { %s28_s22 = sadd.s32 1, %s637_s17  ;;  %s31_s23 = sadd.s32 1, %s641_s18 }
   0x9   : > { %p29_p0 = scmp.ge.s32.totalorder %s28_s22, 2  ;;  %s40_s24 = sadd.s32 1, %s625_s14 }
   0xa   : > { %p47_p1 = scmp.ne.s32.totalorder %s625_s14, %s621_s13  ;;  %p48_p2 = scmp.eq.s32.totalorder %s645_s19, 0 }
   0xb   : > { %s898_s22 = smov (%p29_p0, %s28_s22), 0  ;;  %s900_s23 = smov (!%p29_p0, %s31_s23), %s641_s18 }
   0xc   : > { %s36_s25 = ssub.s32 %s637_s17, %s898_s22  ;;  %p728_p3 = por %p48_p2, %p47_p1 }
   0xd   : > { %p33_p4 = scmp.ge.s32.totalorder %s900_s23, 2  ;;  %p53_p5 = scmp.ne.s32.totalorder %s621_s13, %s617_s12 }
   0xe   : > { %p54_p6 = scmp.eq.s32.totalorder %s405_s20, 0  ;;  %p121_p7 = scmp.eq.s32.totalorder %s405_s20, 3 }
   0xf   : > { %s902_s23 = smov (%p33_p4, %s900_s23), 0  ;;  %p127_p10 = scmp.eq.s32.totalorder %s406_s21, 3 }
  0x10   : > { %882 = sst [smem:[#allocation8_spill]] %s902_s23  ;;  %p736_p8 = por %p54_p6, %p53_p5 }
  0x11   : > { %p740_p9 = por %p121_p7, %p47_p1  ;;  %s35_s29 = ssub.s32 %s641_s18, %s902_s23 }
  0x12   : > { %s37_s30 = sor.u32 %s36_s25, %s35_s29  ;;  %p746_p12 = por %p127_p10, %p53_p5 }
  0x13   : > { %s884_s28 = scalar_select %p740_p9, 1, 0 }
  0x14   : > { %p38_p11 = scmp.eq.s32.totalorder %s37_s30, 0  ;;  %p444_p13 = scmp.lt.s32.totalorder %s645_s19, 4 }
  0x15   : > { %s885_s4 = scalar_select %p746_p12, 1, 0 }
  0x16   : > { %s153_s5 = sand.u32 1, %s625_s14   ;;  %s410_s8 = sshll.u32 %s641_s18, 3 }
  0x17   : > { %s753_s6 = scalar_select %p38_p11, %s625_s14, %s40_s24  }
  0x18   : > { %s409_s7 = sshll.u32 %s153_s5, 4  ;;  %s162_s9 = sadd.s32 %s637_s17, %s410_s8 }
  0x19   : > { %s157_s10 = scalar_lea.vmem [#allocation2], %s409_s7  ;;  %s411_s20 = sshll.u32 %s162_s9, 6 }
  0x1a   : > { %s165_s11 = sshll.u32 %s157_s10, 4  ;;  %s762_s25 = scalar_lea.hbm %s875_s0, %s411_s20  ;;  %s757_s11 = int_to_ptr.vmem [resolvable:$true] %s165_s11 }
  0x1b   : > { %p766_p0 = pnand %p444_p13, %p728_p3  ;;  %s770_s29 = scalar_lea.sflag [#allocation3], %s153_s5 }
  0x1c   : > { %s517_s30 = scalar_lea.hbm %s762_s25, 256  ;;  %s522_s7 = scalar_lea.hbm %s875_s0, 1024 }
  0x1d   : > { %p518_p1 = scmp.ne.s32.totalorder %s762_s25, %s517_s30  ;;  %p519_p2 = pneg %p766_p0 }
  0x1e   : > { %p523_p3 = scmp.lt.u32.totalorder %s762_s25, %s875_s0  ;;  %p524_p6 = scmp.lt.u32.totalorder %s522_s7, %s517_s30 }
  0x1f   : > { %p520_p4 = pnand %p519_p2, %p518_p1  ;;  %p526_p10 = scmp.lt.u32.totalorder %s517_s30, %s762_s25 }
  0x20   : > { %p525_p7 = por %p524_p6, %p523_p3 }
  0x21   : > { %p521_p5 = pneg %p520_p4 }
  0x22   : > { %p527_p11 = por %p526_p10, %p525_p7 }
  0x24   : > { %p528_p13 = pnand %p527_p11, %p521_p5 }
  0x26   : > { %531 = shalt.err (!%p528_p13)
}
  0x27   : > { %s532_s5 = scalar_lea.vmem %s757_s11, 256  ;;  %s647_s10 = smov [#allocation2]  }
  0x28   : > { %p533_p1 = scmp.ne.s32.totalorder %s757_s11, %s532_s5  ;;  %s537_s20 = sshll.u32 %s647_s10, 4  ;;  %s538_s20 = int_to_ptr.vmem [resolvable:$false] %s537_s20 }
  0x29   : > { %s539_s21 = scalar_lea.vmem %s538_s20, 512  ;;  %p540_p9 = scmp.lt.s32.totalorder %s757_s11, %s538_s20 }
  0x2a   : > { %p535_p4 = pnand %p533_p1, %p519_p2  ;;  %p541_p3 = scmp.lt.s32.totalorder %s539_s21, %s532_s5 }
  0x2c   : > { %p536_p12 = pneg %p535_p4  ;;  %p542_p6 = por %p541_p3, %p540_p9 }
  0x2e   : > { %p543_p7 = pnand %p542_p6, %p536_p12 }
  0x30   : > { %546 = shalt.err (!%p543_p7)
}
  0x31   : > { %s648_s30 = smov 128   ;;  %s649_s23 = smov 64  }
  0x32   : > { %s650_s26 = smov 4   ;;  %p412_p2 = scmp.ge.s32.totalorder %s645_s19, 1 }
  0x33   : > { %439 = dma.hbm_to_vmem [thread:$0]  (!%p766_p0), %s762_s25, 256, %s757_s11, %s770_s29, %s648_s30, %s649_s23, %s650_s26  }
  0x34   : > { %p173_p5 = scmp.lt.s32.totalorder %s645_s19, 5 }
  0x36   : > { %p174_p10 = pnand %p412_p2, %p173_p5 }
  0x37   : > { %s801_s7 = sand.u32 (!%p174_p10), 1, %s621_s13  }
  0x38   : > { %177 = sbr.rel (%p174_p10) target bundleno = 303 (0x12f), region = 32  ;;  %s413_s8 = sshll.u32 (!%p174_p10), %s801_s7, 4 }
  0x39   : > { %s180_s9 = scalar_lea.sflag (!%p174_p10), [#allocation3], %s801_s7  ;;  %s183_s5 = scalar_lea.vmem (!%p174_p10), [#allocation2], %s413_s8 }
  0x3f   : > { %608 = dma.done.wait (%p736_p8), %s180_s9, 256  }
  0x40   : > { %610 = vsyncadd (%p736_p8), %s180_s9, 4294967040  ;;  %v651_v0 = vmov 0.0   ;;  %vm652_vm0 = vmmov 0   ;;  %v653_v1 = vmov 0   ;;  %v206_v2 = vld [vmem:[%s183_s5] sm:$0xf] }
  0x41   : > { %427 = vmatprep.subr.mxu0 %v651_v0  ;;  %429 = vmatprep.mubr.msk.f32.mxu0 %vm652_vm0, %v651_v0  ;;  %v415_v3 = vld [vmem:[%s183_s5 + $0x4] sm:$0xf]  ;;  %v416_v4 = vld [vmem:[%s183_s5 + $0x8] sm:$0xf]  ;;  %v417_v7 = vld [vmem:[%s183_s5 + $0xc] sm:$0xf] }
  0x42   : > { %516 = vset.pattern.permute.xlu0 %v653_v1  ;;  %v209_v5 = vadd.f32 %v415_v3, %v206_v2  ;;  %v296_v6 = vld [vmem:[%s877_s2] sm:$0xff]  ;;  %vm221_vm1 = vcmask 1043456   ;;  %vm217_vm2 = vcmask 31744   ;;  %s414_s29 = sshll.u32 %s801_s7, 3  ;;  %s421_s10 = sshll.u32 %s633_s16, 1 }
  0x43   : > { %299 = vperm.xlu0 %516, %v296_v6   ;;  %v216_v10 = vld [vmem:[%s876_s1] sm:$0xff]  ;;  %s316_s20 = sadd.s32 %s629_s15, %s421_s10  ;;  %s205_s30 = scalar_lea.vmem [#allocation5], %s414_s29 }
  0x44   : > { %v212_v8 = vadd.f32 %v416_v4, %v209_v5  ;;  %s422_s21 = sshll.u32 %s316_s20, 7  ;;  %s320_s23 = sshll.u32 %s205_s30, 4  ;;  %s823_s23 = int_to_ptr.vmem [resolvable:$true] %s320_s23 }
  0x45   : > { %s821_s9 = scalar_lea.hbm %s878_s3, %s422_s21  ;;  %s305_s15 = scalar_lea.sflag [#allocation4], %s801_s7 }
  0x46   : > { %v215_v9 = vadd.f32 %v417_v7, %v212_v8  ;;  %s547_s16 = scalar_lea.vmem %s823_s23, 128  ;;  %p887_p9 = scmp.ne.s32.totalorder %s884_s28, 0 }
  0x47   : > { %p548_p8 = scmp.ne.s32.totalorder %s823_s23, %s547_s16  ;;  %s654_s5 = smov [#allocation5]  }
  0x48   : > { %428 = vmatpush3.msk.msra.mxu0 %vm221_vm1, %v215_v9  ;;  %s551_s11 = sshll.u32 %s654_s5, 4  ;;  %s552_s11 = int_to_ptr.vmem [resolvable:$false] %s551_s11 }
  0x49   : > { %430 = vmatmul.mubr.msk.f32.vlgmr.msra.gmra.mrb[0].mxu0 %vm217_vm2, %v216_v10  ;;  %p549_p12 = pnand %p548_p8, %p887_p9  ;;  %s553_s25 = scalar_lea.vmem %s552_s11, 256 }
  0x4a   : > { %p554_p11 = scmp.lt.s32.totalorder %s823_s23, %s552_s11  ;;  %p555_p13 = scmp.lt.s32.totalorder %s553_s25, %s547_s16 }
  0x4b   : > { %p550_p0 = pneg %p549_p12 }
  0x4c   : > { %p556_p1 = por %p555_p13, %p554_p11 }
  0x4e   : > { %p557_p4 = pnand %p556_p1, %p550_p0 }
  0xc2   : > { %v300_v12 = vpop.permute.xlu0 %299 }
 0x11c   : > { %v291_v11 = vpop.f32.mrb[0].mxu0 }
 0x11d   : > { %v295_v13 = vmul.f32 0.25, %v291_v11  ;;  %v431_v14 = vpop.f32.mrb[1].mxu0 }
 0x11f   : > { %v302_v15 = vadd.f32 %v300_v12, %v295_v13 }
 0x121   : > { %303 = vst [vmem:[%s205_s30] sm:$0xff] %v302_v15 }
 0x122   : > { %560 = shalt.err (!%p557_p4)
}
 0x123   : > { %s561_s7 = scalar_lea.hbm %s821_s9, 128  ;;  %s565_s29 = scalar_lea.hbm %s878_s3, 512 }
 0x124   : > { %p562_p3 = scmp.ne.s32.totalorder %s821_s9, %s561_s7  ;;  %p566_p2 = scmp.lt.u32.totalorder %s821_s9, %s878_s3 }
 0x125   : > { %p567_p5 = scmp.lt.u32.totalorder %s565_s29, %s561_s7  ;;  %p569_p8 = scmp.lt.u32.totalorder %s561_s7, %s821_s9 }
 0x126   : > { %p563_p6 = pnand %p562_p3, %p887_p9 }
 0x127   : > { %p568_p10 = por %p567_p5, %p566_p2 }
 0x128   : > { %p564_p7 = pneg %p563_p6 }
 0x129   : > { %p570_p12 = por %p569_p8, %p568_p10 }
 0x12b   : > { %p571_p0 = pnand %p570_p12, %p564_p7 }
 0x12d   : > { %574 = shalt.err (!%p571_p0)
}
 0x12e   : > { %434 = dma.vmem_to_hbm [thread:$0]  (%p887_p9), %s823_s23, 128, %s821_s9, %s305_s15  }
 0x12f PF: > { %p445_p11 = scmp.ge.s32.totalorder %s645_s19, 2  ;;  %s332_s21 = sand.u32 1, %s617_s12  }
 0x130   : > { %p888_p13 = scmp.ne.s32.totalorder %s885_s4, 0  ;;  %s333_s30 = scalar_lea.sflag [#allocation4], %s332_s21 }
 0x132   : > { %p441_p1 = pnand %p445_p11, %p888_p13 }
 0x134   : > { %612 = dma.done.wait (!%p441_p1), %s333_s30, 128  }
 0x135   : > { %614 = vsyncadd (!%p441_p1), %s333_s30, 4294967168  ;;  %s19_s19 = sadd.s32 1, %s645_s19   ;;  %s889_s28 = sld [smem:[#allocation8_spill]] }
 0x136   : > { %p16_p4 = scmp.ge.s32.totalorder %s19_s19, 6   ;;  %s890_s12 = smov %s621_s13 }
 0x137   : > { %s891_s13 = smov %s625_s14  ;;  %s892_s14 = smov %s753_s6 }
 0x138   : > { %s893_s15 = smov %s637_s17  ;;  %s894_s16 = smov %s641_s18 }
 0x139   : > { %s895_s17 = smov %s898_s22  ;;  %18 = sbr.rel (!%p16_p4) target bundleno = 7 (0x7), region = 80 }
 0x13b   : > { %s896_s18 = smov %s889_s28 }
 0x140   :  { %338 = vsyncpa [#allocation3], 1 }
 0x141   :  { %340 = vsyncpa [#allocation3 + $0x1], 1 }
 0x142   :  { %341 = vsyncpa [#allocation4], 1 }
 0x143   :  { %343 = vsyncpa [#allocation4 + $0x1], 1 }

</bundles_post_ra>
